<compile_context>
chip_gen: v5e
topology: v5e:2x2
jax: 0.10.0
libtpu: 0.0.40
codegen_flags: <defaults>
</compile_context>

<pallas_src>
import functools

import jax
import jax.numpy as jnp
from jax.experimental import pallas as pl
from jax.experimental.pallas import tpu as pltpu


def _round_up(x, m):
    return (x + m - 1) // m * m


def _pick_tile(total, max_tile, quantum):
    """Largest multiple of `quantum` dividing `total`, <= max(max_tile, quantum)."""
    q = total // quantum
    cap = max(max_tile, quantum)
    best = 1
    for d in range(1, q + 1):
        if q % d == 0 and d * quantum <= cap:
            best = d
    return best * quantum


def _proj_kernel_single_k(p_ref, w_ref, b_ref, o_ref):
    """Fast path (n_k == 1): one MXU pass, bias add in f32, single store."""
    o_ref[...] = (jnp.dot(p_ref[...], w_ref[...],
                          preferred_element_type=jnp.float32)
                  + b_ref[...]).astype(o_ref.dtype)


def _proj_kernel_multi_k(p_ref, w_ref, b_ref, o_ref, acc_ref):
    """K-split path: f32 VMEM accumulator initialized with the broadcast bias."""
    k = pl.program_id(2)

    @pl.when(k == 0)
    def _():
        acc_ref[...] = jnp.broadcast_to(b_ref[...], acc_ref.shape)

    acc_ref[...] += jnp.dot(p_ref[...], w_ref[...],
                            preferred_element_type=jnp.float32)

    @pl.when(k == pl.num_programs(2) - 1)
    def _():
        o_ref[...] = acc_ref[...].astype(o_ref.dtype)


@functools.partial(
    jax.jit, static_argnames=("patch_size", "tile_m", "tile_k", "use_bf16"))
def image_patcher_forward(images, weight_t, bias, *, patch_size,
                          tile_m=256, tile_k=None, use_bf16=True):
    """Replicates ImagePatcher.forward.

    Args:
      images:   [B, C, H, W]  (NCHW, like PyTorch)
      weight_t: [C*P*P, embed_dim]  (transposed nn.Linear weight)
      bias:     [embed_dim]
      patch_size: P
    Returns:
      [B, num_patches, embed_dim] in images.dtype.
    """
    B, C, H, W = images.shape
    P = patch_size
    assert H % P == 0 and W % P == 0, "H and W must be divisible by patch_size"
    Hp, Wp = H // P, W // P
    num_patches = Hp * Wp
    K = C * P * P
    E = weight_t.shape[1]
    assert weight_t.shape[0] == K and bias.shape == (E,)

    out_dtype = images.dtype
    compute_dtype = jnp.bfloat16 if use_bf16 else images.dtype

    # ---- patch extraction (layout glue; fused by XLA under this jit) --------
    x = images.astype(compute_dtype)                 # cast BEFORE the transpose
    x = x.reshape(B, C, Hp, P, Wp, P)
    x = jnp.transpose(x, (0, 2, 4, 1, 3, 5))         # [B, Hp, Wp, C, P, P]
    patches = x.reshape(B * num_patches, K)          # feature order (C,Ph,Pw)

    M = B * num_patches
    E_pad = _round_up(E, 128)
    K_pad = _round_up(K, 128)
    qk = 256 if K_pad % 256 == 0 else 128            # v6e/v7x MXU is 2x256x256
    qe = 256 if E_pad % 256 == 0 else 128

    # ---- M tiling: tm divides round_up(M, 8) -> no M padding in common cases
    M_pad = _round_up(M, 8)
    tm = _pick_tile(M_pad, tile_m, 8)
    n_m = M_pad // tm

    # ---- E tiling: full width by default; split only to feed both v7x TCs ---
    te = E_pad
    if n_m < 2 and E_pad // qe >= 2:
        te = _pick_tile(E_pad, E_pad // 2, qe)
    n_e = E_pad // te

    # ---- VMEM budget (75% of physical; conservative v7x-sized fallback) -----
    try:
        vmem_cap = int(pltpu.get_tpu_info().vmem_capacity_bytes)
    except Exception:
        vmem_cap = 64 * 1024 * 1024
    budget = (vmem_cap * 3) // 4

    in_b = jnp.dtype(compute_dtype).itemsize
    out_b = jnp.dtype(out_dtype).itemsize

    def working_set(tm_, tk_, n_k_):
        est = (2 * tm_ * tk_ * in_b          # lhs tiles (double-buffered)
               + 2 * tk_ * te * in_b         # weight tiles
               + 2 * te * 4                  # bias (f32)
               + 2 * tm_ * te * out_b)       # output tiles
        if n_k_ > 1:
            est += tm_ * te * 4              # f32 accumulator
        return est

    # ---- K tiling: prefer a single K step; split only when over budget ------
    tk_cap = K_pad if tile_k is None else max(qk, _round_up(tile_k, qk))
    divisors = [d * qk for d in range(K_pad // qk, 0, -1)
                if K_pad % (d * qk) == 0]    # descending
    tk = divisors[-1]
    for cand in divisors:
        if cand <= tk_cap and working_set(tm, cand, K_pad // cand) <= budget:
            tk = cand
            break
    n_k = K_pad // tk

    # Last resort: shrink tm if the working set still exceeds the budget.
    while working_set(tm, tk, n_k) > budget and tm > 8:
        tm = max(8, _round_up(tm // 2, 8))
    M_pad = _round_up(M, tm)
    n_m = M_pad // tm

    # ---- pad operands only when needed ---------------------------------------
    if M_pad != M or K_pad != K:
        patches = jnp.pad(patches, ((0, M_pad - M), (0, K_pad - K)))
    w = weight_t.astype(compute_dtype)
    if K_pad != K or E_pad != E:
        w = jnp.pad(w, ((0, K_pad - K), (0, E_pad - E)))
    b = bias.astype(jnp.float32).reshape(1, E)
    if E_pad != E:
        b = jnp.pad(b, ((0, 0), (0, E_pad - E)))

    est = working_set(tm, tk, n_k)
    vmem_limit = int(min(budget, max(2 * est, 32 * 1024 * 1024)))

    if n_k == 1:
        kernel = _proj_kernel_single_k
        scratch = []
    else:
        kernel = _proj_kernel_multi_k
        scratch = [pltpu.VMEM((tm, te), jnp.float32)]

    out_flat = pl.pallas_call(
        kernel,
        out_shape=jax.ShapeDtypeStruct((M_pad, E_pad), out_dtype),
        grid=(n_m, n_e, n_k),
        in_specs=[
            pl.BlockSpec((tm, tk), lambda i, j, k: (i, k)),   # patch tiles
            pl.BlockSpec((tk, te), lambda i, j, k: (k, j)),   # weight
            pl.BlockSpec((1, te), lambda i, j, k: (0, j)),    # bias (f32)
        ],
        out_specs=pl.BlockSpec((tm, te), lambda i, j, k: (i, j)),
        scratch_shapes=scratch,
        compiler_params=pltpu.CompilerParams(
            dimension_semantics=("parallel", "parallel", "arbitrary"),
            vmem_limit_bytes=vmem_limit),
    )(patches, w, b)

    out = out_flat
    if M_pad != M or E_pad != E:
        out = out[:M, :E]
    return out.reshape(B, num_patches, E)


def reference_forward(images, weight_t, bias, patch_size):
    """Plain-JAX reference matching torch unfold/permute/view + Linear."""
    B, C, H, W = images.shape
    P = patch_size
    Hp, Wp = H // P, W // P
    x = images.reshape(B, C, Hp, P, Wp, P)
    x = jnp.transpose(x, (0, 2, 4, 1, 3, 5)).reshape(B, Hp * Wp, C * P * P)
    return jnp.dot(x, weight_t, precision=jax.lax.Precision.HIGHEST) + bias


if __name__ == "__main__":
    key = jax.random.PRNGKey(0)

    def make_case(B, C, H, W, P, E, k):
        k_img, k_w, k_b = jax.random.split(k, 3)
        K = C * P * P
        images = jax.random.normal(k_img, (B, C, H, W), dtype=jnp.float32)
        bound = 1.0 / (K ** 0.5)
        weight = jax.random.uniform(k_w, (E, K), minval=-bound, maxval=bound,
                                    dtype=jnp.float32)
        bias = jax.random.uniform(k_b, (E,), minval=-bound, maxval=bound,
                                  dtype=jnp.float32)
        return images, weight.T, bias

    k0, k1 = jax.random.split(key)

    # Case 1: single-K-step fast path. batch=2, channels=4, 16x16, P=8, E=128.
    B, C, H, W, P, E = 2, 4, 16, 16, 8, 128
    images, weight_t, bias = make_case(B, C, H, W, P, E, k0)
    ref = reference_forward(images, weight_t, bias, P)

    out_bf16 = jax.block_until_ready(
        image_patcher_forward(images, weight_t, bias, patch_size=P))  # bf16 default
    assert out_bf16.shape == (B, (H // P) * (W // P), E)
    assert jnp.allclose(out_bf16, ref, atol=5e-2, rtol=5e-2), \
        float(jnp.max(jnp.abs(out_bf16 - ref)))

    out_f32 = jax.block_until_ready(
        image_patcher_forward(images, weight_t, bias, patch_size=P,
                              use_bf16=False))
    assert jnp.allclose(out_f32, ref, atol=5e-3, rtol=5e-3), \
        float(jnp.max(jnp.abs(out_f32 - ref)))

    # Case 2: K-split accumulator path (K=1024, tile_k=256 -> 4 K steps), f32.
    B, C, H, W, P, E = 2, 4, 32, 32, 16, 128
    images, weight_t, bias = make_case(B, C, H, W, P, E, k1)
    ref = reference_forward(images, weight_t, bias, P)
    out_ks = jax.block_until_ready(
        image_patcher_forward(images, weight_t, bias, patch_size=P,
                              tile_k=256, use_bf16=False))
    assert out_ks.shape == (B, (H // P) * (W // P), E)
    assert jnp.allclose(out_ks, ref, atol=5e-3, rtol=5e-3), \
        float(jnp.max(jnp.abs(out_ks - ref)))

    print("KERNEL_OK")
</pallas_src>

<mosaic_0001>
module attributes {stable_mosaic.version = 11 : i64} {
  func.func @_proj_kernel_single_k(%arg0: i32, %arg1: i32, %arg2: i32, %arg3: memref<8x256xbf16, #tpu.memory_space<vmem>>, %arg4: memref<256x128xbf16, #tpu.memory_space<vmem>>, %arg5: memref<1x128xf32, #tpu.memory_space<vmem>>, %arg6: memref<8x128xf32, #tpu.memory_space<vmem>>) attributes {dimension_semantics = [#tpu.dimension_semantics<parallel>, #tpu.dimension_semantics<parallel>, #tpu.dimension_semantics<arbitrary>], iteration_bounds = array<i64: 1, 1, 1>, scalar_prefetch = 0 : i64, scratch_operands = 0 : i64, tpu.core_type = #tpu.core_type<tc>, window_params = [{transform_indices = @transform_0, window_bounds = array<i64: 8, 256>}, {transform_indices = @transform_1, window_bounds = array<i64: 256, 128>}, {transform_indices = @transform_2, window_bounds = array<i64: 1, 128>}, {transform_indices = @transform_3, window_bounds = array<i64: 8, 128>}]} {
    %c0 = arith.constant 0 : index
    %c0_0 = arith.constant 0 : index
    %0 = vector.load %arg3[%c0, %c0_0] : memref<8x256xbf16, #tpu.memory_space<vmem>>, vector<8x256xbf16>
    %c0_1 = arith.constant 0 : index
    %c0_2 = arith.constant 0 : index
    %1 = vector.load %arg4[%c0_1, %c0_2] : memref<256x128xbf16, #tpu.memory_space<vmem>>, vector<256x128xbf16>
    %cst = arith.constant dense<0.000000e+00> : vector<8x128xf32>
    %2 = tpu.matmul %0, %1, %cst {dimension_numbers = #tpu.dot_dimension_numbers<[1], [0], [0], [1], [0, 0, 1, 1], [], []>} : vector<8x256xbf16>, vector<256x128xbf16>, vector<8x128xf32> -> vector<8x128xf32>
    %c0_3 = arith.constant 0 : index
    %c0_4 = arith.constant 0 : index
    %3 = vector.load %arg5[%c0_3, %c0_4] : memref<1x128xf32, #tpu.memory_space<vmem>>, vector<1x128xf32>
    %4 = vector.broadcast %3 : vector<1x128xf32> to vector<8x128xf32>
    %5 = arith.addf %2, %4 : vector<8x128xf32>
    %c0_5 = arith.constant 0 : index
    %c0_6 = arith.constant 0 : index
    %6 = vector.load %arg6[%c0_5, %c0_6] : memref<8x128xf32, #tpu.memory_space<vmem>>, vector<8x128xf32>
    tpu.vector_store %arg6[%c0_5, %c0_6], %5 {strides = array<i32>} : memref<8x128xf32, #tpu.memory_space<vmem>>, vector<8x128xf32>,
    return
  }
  func.func @transform_0(%arg0: i32, %arg1: i32, %arg2: i32) -> (i32, i32) {
    %c0_i32 = arith.constant 0 : i32
    return %arg0, %arg2 : i32, i32
  }
  func.func @transform_1(%arg0: i32, %arg1: i32, %arg2: i32) -> (i32, i32) {
    %c0_i32 = arith.constant 0 : i32
    return %arg2, %arg1 : i32, i32
  }
  func.func @transform_2(%arg0: i32, %arg1: i32, %arg2: i32) -> (i32, i32) {
    %c0_i32 = arith.constant 0 : i32
    %c0_i32_0 = arith.constant 0 : i32
    return %c0_i32, %arg1 : i32, i32
  }
  func.func @transform_3(%arg0: i32, %arg1: i32, %arg2: i32) -> (i32, i32) {
    %c0_i32 = arith.constant 0 : i32
    return %arg0, %arg1 : i32, i32
  }
}

</mosaic_0001>

<bundles_post_ra>
// kernel: image_patcher_forward.1
= control target key start
LH: loop header
LB: loop body
LE: loop exit
PB: predicated region body
PF: predicated region fallthrough
CT: control target
= control target key end

     0   :  { %s384_s0 = inlined_call_operand.vmem [shape: bf16[8,256], index: 0, kind: input, shape index: {}]   ;;  %s385_s1 = inlined_call_operand.vmem [shape: bf16[256,128], index: 1, kind: input, shape index: {}]   ;;  %s386_s2 = inlined_call_operand.vmem [shape: f32[1,128], index: 2, kind: input, shape index: {}]   ;;  %s387_s3 = inlined_call_operand.hbm [shape: f32[8,128], index: 3, kind: output, shape index: {}]  }
   0x1   :  { %v269_v0 = vld [vmem:[%s385_s1 + $0x38] sm:$0xff]  ;;  %v268_v2 = vld [vmem:[%s385_s1 + $0x30] sm:$0xff]  ;;  %v267_v4 = vld [vmem:[%s385_s1 + $0x28] sm:$0xff] }
   0x2   :  { %v277_v1 = vld [vmem:[%s385_s1 + $0x78] sm:$0xff]  ;;  %155 = vmatpush.bf16.msra.mxu0 %v269_v0  ;;  %v276_v3 = vld [vmem:[%s385_s1 + $0x70] sm:$0xff]  ;;  %v275_v5 = vld [vmem:[%s385_s1 + $0x68] sm:$0xff] }
   0x3   :  { %168 = vmatpush.bf16.msra.mxu1 %v277_v1 }
   0x6   :  { %156 = vmatpush.bf16.msra.mxu0 %v268_v2 }
   0x7   :  { %169 = vmatpush.bf16.msra.mxu1 %v276_v3 }
   0x8   :  { %8 = vsyncpa [#allocation3], 0  ;;  %v266_v6 = vld [vmem:[%s385_s1 + $0x20] sm:$0xff]  ;;  %v265_v8 = vld [vmem:[%s385_s1 + $0x18] sm:$0xff]  ;;  %s306_s20 = smov [#allocation2]   ;;  %s189_s24 = sshll.u32 %s387_s3, 4  ;;  %s190_s24 = int_to_ptr.hbm [resolvable:$true] %s189_s24 }
   0x9   :  { %v274_v7 = vld [vmem:[%s385_s1 + $0x60] sm:$0xff]  ;;  %v273_v9 = vld [vmem:[%s385_s1 + $0x58] sm:$0xff]  ;;  %v264_v10 = vld [vmem:[%s385_s1 + $0x10] sm:$0xff]  ;;  %s187_s21 = sshll.u32 %s306_s20, 4  ;;  %s188_s21 = int_to_ptr.vmem [resolvable:$true] %s187_s21 }
   0xa   :  { %157 = vmatpush.bf16.msra.mxu0 %v267_v4  ;;  %v272_v11 = vld [vmem:[%s385_s1 + $0x50] sm:$0xff]  ;;  %v263_v12 = vld [vmem:[%s385_s1 + $0x8] sm:$0xff]  ;;  %v15_v14 = vld [vmem:[%s384_s0] sm:$0xff] }
   0xb   :  { %170 = vmatpush.bf16.msra.mxu1 %v275_v5  ;;  %v271_v13 = vld [vmem:[%s385_s1 + $0x48] sm:$0xff]  ;;  %v53_v15 = vunpack.c.l.b16 %v15_v14  ;;  %v54_v16 = vunpack.c.h.b16 %v15_v14  ;;  %v262_v17 = vld [vmem:[%s385_s1] sm:$0xff] }
   0xc   :  { %v270_v18 = vld [vmem:[%s385_s1 + $0x40] sm:$0xff] }
   0xd   :  { %v55_v19 = vpack.c.b16 %v53_v15, %v53_v15  ;;  %v56_v20 = vpack.c.b16 %v54_v16, %v54_v16  ;;  %v279_v21 = vld [vmem:[%s386_s2] ss:$0 sm:$0xff] }
   0xe   :  { %158 = vmatpush.bf16.msra.mxu0 %v266_v6 }
   0xf   :  { %171 = vmatpush.bf16.msra.mxu1 %v274_v7 }
  0x12   :  { %159 = vmatpush.bf16.msra.mxu0 %v265_v8 }
  0x13   :  { %172 = vmatpush.bf16.msra.mxu1 %v273_v9 }
  0x16   :  { %160 = vmatpush.bf16.msra.mxu0 %v264_v10 }
  0x17   :  { %173 = vmatpush.bf16.msra.mxu1 %v272_v11 }
  0x1a   :  { %161 = vmatpush.bf16.msra.mxu0 %v263_v12 }
  0x1b   :  { %174 = vmatpush.bf16.msra.mxu1 %v271_v13 }
  0x1e   :  { %162 = vmatpush.bf16.msra.mxu0 %v262_v17 }
  0x1f   :  { %175 = vmatpush.bf16.msra.mxu1 %v270_v18 }
  0x21   :  { %163 = vmatmul.bf16.vlgmr.msra.gmra.mxu0 %v55_v19 }
  0x22   :  { %176 = vmatmul.bf16.vlgmr.msra.gmra.mxu1 %v56_v20 }
  0x9e   :  { %v164_v22 = vpop.f32.mrf.mxu0 }
  0x9f   :  { %v177_v23 = vpop.f32.mrf.mxu1  ;;  %v165_v24 = vadd.f32 %v279_v21, %v164_v22 }
  0xa1   :  { %v178_v25 = vadd.f32 %v177_v23, %v165_v24 }
  0xa3   :  { %181 = vst [vmem:[#allocation2] sm:$0xff] %v178_v25 }
  0xa4   :  { %192 = dma.vmem_to_hbm [thread:$0]  %s188_s21, 128, %s190_s24, [#allocation3]  }
  0xa6   :  { %v166_v26 = vpop.f32.mrf.mxu0 }
  0xa7   :  { %v179_v27 = vpop.f32.mrf.mxu1 }
  0xa8   :  { %304 = dma.done.wait [#allocation3], 128  }
  0xa9   :  { %305 = vsyncadd [#allocation3], 4294967168 }
  0xaa   :  { %197 = vsyncpa [#allocation3], 1 }

</bundles_post_ra>
